<compile_context>
chip_gen: v7x
topology: tpu7x:2x2x1
jax: 0.10.0
libtpu: 0.0.40
codegen_flags: <defaults>
</compile_context>

<pallas_src>
import functools

import jax
import jax.numpy as jnp
from jax.experimental import pallas as pl
from jax.experimental.pallas import tpu as pltpu


def _round_up(x, m):
    return (x + m - 1) // m * m


def _dqn_mlp_kernel(*refs, num_layers):
    """Fused MLP forward for one (TILE_B, in_dim) batch tile.

    refs layout:
      refs[0]              x_ref   (TILE_B, in_dim)    bf16
      refs[1 : 1+L]        w_refs  (d_in_i, d_out_i)   bf16  (resident)
      refs[1+L : 1+2L]     b_refs  (1, d_out_i)        f32   (resident)
      refs[1+2L]           out_ref (TILE_B, out_dim)   f32
    Hidden layers: ReLU(h @ W + b); final layer: h @ W + b (no activation).
    """
    x_ref = refs[0]
    w_refs = refs[1:1 + num_layers]
    b_refs = refs[1 + num_layers:1 + 2 * num_layers]
    out_ref = refs[1 + 2 * num_layers]

    h_bf16 = x_ref[...]                      # bf16 MXU operand
    h = None
    for i in range(num_layers):              # static unroll -> fully visible
        # bf16 MXU matmul with f32 accumulation; bias add + ReLU stay in f32.
        h = jnp.dot(h_bf16, w_refs[i][...],
                    preferred_element_type=jnp.float32) + b_refs[i][...]
        if i < num_layers - 1:
            h = jnp.maximum(h, 0.0)
            h_bf16 = h.astype(jnp.bfloat16)
    out_ref[...] = h


def pack_dqn_params(weights, biases):
    """One-time parameter prep (hoisted out of the per-call forward path).

    Args:
      weights: list of (d_in_i, d_out_i) arrays (pre-transposed, i.e. torch
               weight.T) so the kernel computes h @ W + b.
      biases:  list of (d_out_i,) or (1, d_out_i) arrays.
    Returns:
      (w_packed, b_packed): bf16 weights and (1, d_out_i) f32 biases.
    """
    w_packed = tuple(jnp.asarray(w, jnp.bfloat16) for w in weights)
    b_packed = tuple(jnp.asarray(b, jnp.float32).reshape(1, -1) for b in biases)
    return w_packed, b_packed


def _choose_tile_b(batch):
    # Aim for ~2 grid steps for realistic batches: >=2 lets v7x shard the
    # parallel batch axis over its two TensorCores; few fat steps keep the
    # ~0.35us per-step overhead negligible on single-TC v5e/v6e.
    target_steps = 2 if batch <= 2048 else 4
    return max(8, _round_up(-(-batch // target_steps), 8))


def dqn_forward(x, w_packed, b_packed, *, tile_b=None):
    """Full DQN MLP forward in a single batch-tiled pallas_call.

    Args:
      x:        (B, input_dim) array (any float dtype; torch casts to float,
                the kernel uses bf16 MXU operands with f32 accumulation).
      w_packed: tuple of (d_in_i, d_out_i) bf16 arrays from pack_dqn_params.
      b_packed: tuple of (1, d_out_i) f32 arrays from pack_dqn_params.
      tile_b:   batch tile size (multiple of 8). Default targets ~2 grid steps.
    Returns:
      (B, output_dim) float32.
    """
    num_layers = len(w_packed)
    assert len(b_packed) == num_layers

    B, in_dim = x.shape
    assert w_packed[0].shape[0] == in_dim
    out_dim = w_packed[-1].shape[1]

    if tile_b is None:
        tile_b = _choose_tile_b(B)
    tile_b = max(8, min(tile_b, _round_up(B, 8)))
    assert tile_b % 8 == 0
    b_pad = _round_up(B, tile_b)
    num_tiles = b_pad // tile_b

    # Input at its real feature width, in bf16 (half the DMA bytes; the kernel
    # bf16-rounds matmul operands anyway so numerics are unchanged). Only pad
    # the batch axis when B is not a multiple of the tile.
    xb = x.astype(jnp.bfloat16)
    if b_pad != B:
        xb = jnp.pad(xb, ((0, b_pad - B), (0, 0)))

    # x / out: one batch tile per grid step, real feature widths (legal: the
    # last block dim equals the full array dim).
    x_spec = pl.BlockSpec((tile_b, in_dim), lambda i: (i, 0))
    out_spec = pl.BlockSpec((tile_b, out_dim), lambda i: (i, 0))
    # Weights / biases: resident single blocks (constant index_map), unpadded.
    w_specs = [pl.BlockSpec(w.shape, lambda i: (0, 0)) for w in w_packed]
    b_specs = [pl.BlockSpec(b.shape, lambda i: (0, 0)) for b in b_packed]

    flops = 2 * b_pad * sum(w.shape[0] * w.shape[1] for w in w_packed)
    bytes_accessed = int(
        xb.size * xb.dtype.itemsize
        + sum(w.size * w.dtype.itemsize for w in w_packed)
        + sum(b.size * b.dtype.itemsize for b in b_packed)
        + b_pad * out_dim * 4)

    kernel = functools.partial(_dqn_mlp_kernel, num_layers=num_layers)

    out = pl.pallas_call(
        kernel,
        grid=(num_tiles,),
        in_specs=[x_spec, *w_specs, *b_specs],
        out_specs=out_spec,
        out_shape=jax.ShapeDtypeStruct((b_pad, out_dim), jnp.float32),
        compiler_params=pltpu.CompilerParams(
            dimension_semantics=("parallel",)),
        cost_estimate=pl.CostEstimate(
            flops=flops, transcendentals=0, bytes_accessed=bytes_accessed),
    )(xb, *w_packed, *b_packed)

    return out if b_pad == B else out[:B]


def init_dqn_params(key, input_dim, output_dim, hidden_dims):
    """Deterministic init mimicking nn.Linear's uniform(-1/sqrt(fan_in), +)."""
    dims_in = (input_dim,) + tuple(hidden_dims)
    dims_out = tuple(hidden_dims) + (output_dim,)
    weights, biases = [], []
    for d_in, d_out in zip(dims_in, dims_out):
        key, kw, kb = jax.random.split(key, 3)
        bound = 1.0 / jnp.sqrt(jnp.float32(d_in))
        # stored as (d_in, d_out), i.e. torch's weight.T
        w = jax.random.uniform(kw, (d_in, d_out), jnp.float32, -bound, bound)
        b = jax.random.uniform(kb, (1, d_out), jnp.float32, -bound, bound)
        weights.append(w)
        biases.append(b)
    return weights, biases


def dqn_reference_f32(x, weights, biases):
    """Pure-JAX f32 reference matching the PyTorch forward."""
    h = x.astype(jnp.float32)
    for i, (w, b) in enumerate(zip(weights, biases)):
        h = h @ w + jnp.asarray(b, jnp.float32).reshape(1, -1)
        if i < len(weights) - 1:
            h = jnp.maximum(h, 0.0)
    return h


def dqn_reference_bf16(x, weights, biases):
    """Reference applying the same bf16 operand rounding the kernel uses."""
    h = x.astype(jnp.float32)
    for i, (w, b) in enumerate(zip(weights, biases)):
        hq = h.astype(jnp.bfloat16).astype(jnp.float32)
        wq = jnp.asarray(w, jnp.float32).astype(jnp.bfloat16).astype(jnp.float32)
        h = hq @ wq + jnp.asarray(b, jnp.float32).reshape(1, -1)
        if i < len(weights) - 1:
            h = jnp.maximum(h, 0.0)
    return h


if __name__ == "__main__":
    # DQN(cfg, input_dim=16, output_dim=4, 32, 32)  ->  16 -> 32 -> 32 -> 4
    B, input_dim, output_dim = 256, 16, 4
    hidden_dims = (32, 32)

    key = jax.random.PRNGKey(0)
    key, kx = jax.random.split(key)
    x = jax.random.normal(kx, (B, input_dim), dtype=jnp.float32)

    weights, biases = init_dqn_params(key, input_dim, output_dim, hidden_dims)

    # One-time parameter packing, hoisted out of the forward path.
    w_packed, b_packed = pack_dqn_params(weights, biases)

    # tile_b=128 with B=256 -> 2 parallel grid steps (both v7x TCs busy,
    # minimal per-step overhead on single-TC parts).
    fwd = jax.jit(functools.partial(dqn_forward, tile_b=128))
    out = jax.block_until_ready(fwd(x, w_packed, b_packed))

    assert out.shape == (B, output_dim)

    # Exact-semantics check against a reference with identical bf16 rounding.
    ref_bf16 = dqn_reference_bf16(x, weights, biases)
    assert jnp.allclose(out, ref_bf16, atol=2e-3, rtol=2e-3), \
        "mismatch vs bf16-rounded reference"

    # Loose sanity check against the pure-f32 PyTorch-equivalent reference.
    ref_f32 = dqn_reference_f32(x, weights, biases)
    assert jnp.allclose(out, ref_f32, atol=3e-2, rtol=3e-2), \
        "mismatch vs f32 reference"

    print("KERNEL_OK")
</pallas_src>

<mosaic_0001>
module attributes {stable_mosaic.version = 11 : i64} {
  func.func @_dqn_mlp_kernel(%arg0: i32, %arg1: memref<128x16xbf16, #tpu.memory_space<vmem>>, %arg2: memref<16x32xbf16, #tpu.memory_space<vmem>>, %arg3: memref<32x32xbf16, #tpu.memory_space<vmem>>, %arg4: memref<32x4xbf16, #tpu.memory_space<vmem>>, %arg5: memref<1x32xf32, #tpu.memory_space<vmem>>, %arg6: memref<1x32xf32, #tpu.memory_space<vmem>>, %arg7: memref<1x4xf32, #tpu.memory_space<vmem>>, %arg8: memref<128x4xf32, #tpu.memory_space<vmem>>) attributes {dimension_semantics = [#tpu.dimension_semantics<parallel>], iteration_bounds = array<i64: 2>, scalar_prefetch = 0 : i64, scratch_operands = 0 : i64, tpu.core_type = #tpu.core_type<tc>, window_params = [{transform_indices = @transform_0, window_bounds = array<i64: 128, 16>}, {pipeline_mode = #tpu.pipeline_mode<synchronous>, transform_indices = @transform_1, window_bounds = array<i64: 16, 32>}, {pipeline_mode = #tpu.pipeline_mode<synchronous>, transform_indices = @transform_2, window_bounds = array<i64: 32, 32>}, {pipeline_mode = #tpu.pipeline_mode<synchronous>, transform_indices = @transform_3, window_bounds = array<i64: 32, 4>}, {pipeline_mode = #tpu.pipeline_mode<synchronous>, transform_indices = @transform_4, window_bounds = array<i64: 1, 32>}, {pipeline_mode = #tpu.pipeline_mode<synchronous>, transform_indices = @transform_5, window_bounds = array<i64: 1, 32>}, {pipeline_mode = #tpu.pipeline_mode<synchronous>, transform_indices = @transform_6, window_bounds = array<i64: 1, 4>}, {transform_indices = @transform_7, window_bounds = array<i64: 128, 4>}]} {
    %c0 = arith.constant 0 : index
    %c0_0 = arith.constant 0 : index
    %0 = vector.load %arg1[%c0, %c0_0] : memref<128x16xbf16, #tpu.memory_space<vmem>>, vector<128x16xbf16>
    %c0_1 = arith.constant 0 : index
    %c0_2 = arith.constant 0 : index
    %1 = vector.load %arg2[%c0_1, %c0_2] : memref<16x32xbf16, #tpu.memory_space<vmem>>, vector<16x32xbf16>
    %cst = arith.constant dense<0.000000e+00> : vector<128x32xf32>
    %2 = tpu.matmul %0, %1, %cst {dimension_numbers = #tpu.dot_dimension_numbers<[1], [0], [0], [1], [0, 0, 1, 1], [], []>} : vector<128x16xbf16>, vector<16x32xbf16>, vector<128x32xf32> -> vector<128x32xf32>
    %c0_3 = arith.constant 0 : index
    %c0_4 = arith.constant 0 : index
    %3 = vector.load %arg5[%c0_3, %c0_4] : memref<1x32xf32, #tpu.memory_space<vmem>>, vector<1x32xf32>
    %4 = vector.broadcast %3 : vector<1x32xf32> to vector<128x32xf32>
    %5 = arith.addf %2, %4 : vector<128x32xf32>
    %cst_5 = arith.constant 0.000000e+00 : f32
    %6 = vector.broadcast %cst_5 : f32 to vector<128x32xf32>
    %7 = arith.maximumf %5, %6 : vector<128x32xf32>
    %8 = arith.truncf %7 : vector<128x32xf32> to vector<128x32xbf16>
    %c0_6 = arith.constant 0 : index
    %c0_7 = arith.constant 0 : index
    %9 = vector.load %arg3[%c0_6, %c0_7] : memref<32x32xbf16, #tpu.memory_space<vmem>>, vector<32x32xbf16>
    %cst_8 = arith.constant dense<0.000000e+00> : vector<128x32xf32>
    %10 = tpu.matmul %8, %9, %cst_8 {dimension_numbers = #tpu.dot_dimension_numbers<[1], [0], [0], [1], [0, 0, 1, 1], [], []>} : vector<128x32xbf16>, vector<32x32xbf16>, vector<128x32xf32> -> vector<128x32xf32>
    %c0_9 = arith.constant 0 : index
    %c0_10 = arith.constant 0 : index
    %11 = vector.load %arg6[%c0_9, %c0_10] : memref<1x32xf32, #tpu.memory_space<vmem>>, vector<1x32xf32>
    %12 = vector.broadcast %11 : vector<1x32xf32> to vector<128x32xf32>
    %13 = arith.addf %10, %12 : vector<128x32xf32>
    %cst_11 = arith.constant 0.000000e+00 : f32
    %14 = vector.broadcast %cst_11 : f32 to vector<128x32xf32>
    %15 = arith.maximumf %13, %14 : vector<128x32xf32>
    %16 = arith.truncf %15 : vector<128x32xf32> to vector<128x32xbf16>
    %c0_12 = arith.constant 0 : index
    %c0_13 = arith.constant 0 : index
    %17 = vector.load %arg4[%c0_12, %c0_13] : memref<32x4xbf16, #tpu.memory_space<vmem>>, vector<32x4xbf16>
    %cst_14 = arith.constant dense<0.000000e+00> : vector<128x4xf32>
    %18 = tpu.matmul %16, %17, %cst_14 {dimension_numbers = #tpu.dot_dimension_numbers<[1], [0], [0], [1], [0, 0, 1, 1], [], []>} : vector<128x32xbf16>, vector<32x4xbf16>, vector<128x4xf32> -> vector<128x4xf32>
    %c0_15 = arith.constant 0 : index
    %c0_16 = arith.constant 0 : index
    %19 = vector.load %arg7[%c0_15, %c0_16] : memref<1x4xf32, #tpu.memory_space<vmem>>, vector<1x4xf32>
    %20 = vector.broadcast %19 : vector<1x4xf32> to vector<128x4xf32>
    %21 = arith.addf %18, %20 : vector<128x4xf32>
    %c0_17 = arith.constant 0 : index
    %c0_18 = arith.constant 0 : index
    %22 = vector.load %arg8[%c0_17, %c0_18] : memref<128x4xf32, #tpu.memory_space<vmem>>, vector<128x4xf32>
    tpu.vector_store %arg8[%c0_17, %c0_18], %21 {strides = array<i32>} : memref<128x4xf32, #tpu.memory_space<vmem>>, vector<128x4xf32>,
    return
  }
  func.func @transform_0(%arg0: i32) -> (i32, i32) {
    %c0_i32 = arith.constant 0 : i32
    %c0_i32_0 = arith.constant 0 : i32
    return %arg0, %c0_i32 : i32, i32
  }
  func.func @transform_1(%arg0: i32) -> (i32, i32) {
    %c0_i32 = arith.constant 0 : i32
    %c0_i32_0 = arith.constant 0 : i32
    %c0_i32_1 = arith.constant 0 : i32
    return %c0_i32, %c0_i32_0 : i32, i32
  }
  func.func @transform_2(%arg0: i32) -> (i32, i32) {
    %c0_i32 = arith.constant 0 : i32
    %c0_i32_0 = arith.constant 0 : i32
    %c0_i32_1 = arith.constant 0 : i32
    return %c0_i32, %c0_i32_0 : i32, i32
  }
  func.func @transform_3(%arg0: i32) -> (i32, i32) {
    %c0_i32 = arith.constant 0 : i32
    %c0_i32_0 = arith.constant 0 : i32
    %c0_i32_1 = arith.constant 0 : i32
    return %c0_i32, %c0_i32_0 : i32, i32
  }
  func.func @transform_4(%arg0: i32) -> (i32, i32) {
    %c0_i32 = arith.constant 0 : i32
    %c0_i32_0 = arith.constant 0 : i32
    %c0_i32_1 = arith.constant 0 : i32
    return %c0_i32, %c0_i32_0 : i32, i32
  }
  func.func @transform_5(%arg0: i32) -> (i32, i32) {
    %c0_i32 = arith.constant 0 : i32
    %c0_i32_0 = arith.constant 0 : i32
    %c0_i32_1 = arith.constant 0 : i32
    return %c0_i32, %c0_i32_0 : i32, i32
  }
  func.func @transform_6(%arg0: i32) -> (i32, i32) {
    %c0_i32 = arith.constant 0 : i32
    %c0_i32_0 = arith.constant 0 : i32
    %c0_i32_1 = arith.constant 0 : i32
    return %c0_i32, %c0_i32_0 : i32, i32
  }
  func.func @transform_7(%arg0: i32) -> (i32, i32) {
    %c0_i32 = arith.constant 0 : i32
    %c0_i32_0 = arith.constant 0 : i32
    return %arg0, %c0_i32 : i32, i32
  }
}

</mosaic_0001>

<bundles_post_ra>
// kernel: dqn_forward.1
= control target key start
LH: loop header
LB: loop body
LE: loop exit
PB: predicated region body
PF: predicated region fallthrough
CT: control target
= control target key end

     0   :  { %s1095_s24 = smov 0   ;;  %s1198_s0 = inlined_call_operand.vmem [shape: bf16[256,16], index: 0, kind: input, shape index: {}]   ;;  %s1199_s1 = inlined_call_operand.vmem [shape: bf16[16,32], index: 1, kind: input, shape index: {}]   ;;  %s1200_s2 = inlined_call_operand.vmem [shape: bf16[32,32], index: 2, kind: input, shape index: {}]   ;;  %s1201_s3 = inlined_call_operand.vmem [shape: bf16[32,4], index: 3, kind: input, shape index: {}]   ;;  %s1202_s4 = inlined_call_operand.vmem [shape: f32[1,32], index: 4, kind: input, shape index: {}]   ;;  %s1203_s5 = inlined_call_operand.vmem [shape: f32[1,32], index: 5, kind: input, shape index: {}]   ;;  %s1204_s6 = inlined_call_operand.vmem [shape: f32[1,4], index: 6, kind: input, shape index: {}]   ;;  %s1205_s7 = inlined_call_operand.vmem [shape: f32[256,4], index: 7, kind: output, shape index: {}]  }
   0x1 LB: > { %s886_s25 = sadd.s32 4294967295, %s1053_s24   ;;  %p890_p0 = scmp.ge.s32.totalorder %s1053_s24, 1  ;;  %s1053_s24 = sphi %s1095_s24, %s17_s24  }
   0x2   : > { %p238_p1 = scmp.lt.s32.totalorder %s1053_s24, 3 }
   0x4   : > { %p239_p2 = pnand %p890_p0, %p238_p1 }
   0x5   : > { %v1034_v0 = vld [vmem:[%s1199_s1] sm:$0xff] (!%p239_p2)   ;;  %s891_s28 = sshll.u32 (!%p239_p2), %s886_s25, 4  ;;  %vm354_vm0 = vcmask (!%p239_p2), 130048   ;;  %v1044_v10 = vld [vmem:[%s1200_s2 + $0x8] sm:$0xff] (!%p239_p2)   ;;  %vm523_vm1 = vcmask (!%p239_p2), 261120   ;;  %vm813_vm2 = vcmask (!%p239_p2), 31744  }
   0x6   : > { %242 = sbr.rel (%p239_p2) target bundleno = 704 (0x2c0), region = 48  ;;  %p271_p3 = scmp.lt.s32.totalorder (!%p239_p2), %s891_s28, 31  ;;  %966 = vmatprep.subr.bf16.mxu0 (!%p239_p2), %v1034_v0  ;;  %1024 = vmatprep.subr.bf16.mxu1 (!%p239_p2), %v1034_v0  ;;  %v1043_v1 = vld [vmem:[%s1200_s2] sm:$0xff] (!%p239_p2)  }
   0x7   : > { %967 = vmatpush3.bf16.msra.mxu0 (!%p239_p2), %v1034_v0  ;;  %1025 = vmatpush3.bf16.msra.mxu1 (!%p239_p2), %v1034_v0  ;;  %v1045_v11 = vld [vmem:[%s1201_s3] sm:$0xff] (!%p239_p2)  }
   0x8   : > { %984 = vmatprep.subr.bf16.mxu1 (!%p239_p2), %v1043_v1  ;;  %1004 = vmatprep.subr.bf16.mxu0 (!%p239_p2), %v1045_v11  ;;  %v895_v12 = vld [vmem:[%s1202_s4] ss:$0 sm:$0xff] (!%p239_p2) }
   0xd   : > { %s1207_s28 = smov (!%p271_p3, %s891_s28), 31 }
   0xe   : > { %s892_s8 = sshll.u32 %s1207_s28, 2  ;;  %s894_s22 = sshll.u32 %s1207_s28, 3 }
   0xf   : > { %s274_s11 = scalar_lea.vmem %s1198_s0, %s892_s8  ;;  %s1161_s29 = scalar_lea.vmem %s1205_s7, %s894_s22 }
  0x10   : > { %v1035_v2 = vld [vmem:[%s274_s11] sm:$0xff]   ;;  %v1036_v3 = vld [vmem:[%s274_s11 + $0x8] sm:$0xff]   ;;  %v1037_v4 = vld [vmem:[%s274_s11 + $0x10] sm:$0xff]  }
  0x11   : > { %968 = vmatprep.mubr.msk.bf16.mxu0 %vm354_vm0, %v1035_v2  ;;  %v1039_v5 = vld [vmem:[%s274_s11 + $0x20] sm:$0xff]   ;;  %v1040_v6 = vld [vmem:[%s274_s11 + $0x28] sm:$0xff]   ;;  %v1041_v7 = vld [vmem:[%s274_s11 + $0x30] sm:$0xff]  }
  0x12   : > { %969 = vmatmul.mubr.msk.bf16.vlgmr.msra.gmra.mrb[0].mxu0 %vm354_vm0, %v1036_v3  ;;  %976 = vmatprep.mubr.msk.bf16.mxu1 %vm354_vm0, %v1039_v5  ;;  %v1038_v8 = vld [vmem:[%s274_s11 + $0x18] sm:$0xff]   ;;  %v1046_v5 = vld [vmem:[%s1201_s3 + $0x8] sm:$0xff]  }
  0x13   : > { %972 = vmatprep.mubr.msk.bf16.mxu0 %vm354_vm0, %v1037_v4  ;;  %977 = vmatmul.mubr.msk.bf16.vlgmr.msra.gmra.mrb[0].mxu1 %vm354_vm0, %v1040_v6  ;;  %v1042_v9 = vld [vmem:[%s274_s11 + $0x38] sm:$0xff]   ;;  %v913_v6 = vld [vmem:[%s1203_s5] ss:$0 sm:$0xff] }
  0x14   : > { %980 = vmatprep.mubr.msk.bf16.mxu1 %vm354_vm0, %v1041_v7  ;;  %985 = vmatpush3.bf16.msra.mxu1 %v1043_v1 }
  0x15   : > { %986 = vmatprep.subr.bf16.mxu1 %v1044_v10  ;;  %1005 = vmatpush3.bf16.msra.mxu0 %v1045_v11 }
  0x16   : > { %1006 = vmatprep.subr.bf16.mxu0 %v1046_v5 }
  0x18   : > { %987 = vmatpush3.bf16.msra.mxu1 %v1044_v10 }
  0x19   : > { %1007 = vmatpush3.bf16.msra.mxu0 %v1046_v5 }
  0x1a   : > { %973 = vmatmul.mubr.msk.bf16.gmra.mrb[4].mxu0 %vm354_vm0, %v1038_v8 }
  0x1b   : > { %981 = vmatmul.mubr.msk.bf16.gmra.mrb[4].mxu1 %vm354_vm0, %v1042_v9 }
  0xe5   : > { %v970_v13 = vpop.f32.mrb[0].mxu0 }
  0xe6   : > { %v422_v14 = vadd.f32 %v970_v13, %v895_v12  ;;  %v413_v15 = vpop.f32.mrb[1].mxu0  ;;  %v978_v21 = vpop.f32.mrb[0].mxu1 }
  0xe7   : > { %v414_v16 = vadd.f32 %v895_v12, %v413_v15  ;;  %v971_v17 = vpop.f32.mrb[2].mxu0  ;;  %v454_v24 = vadd.f32 %v978_v21, %v895_v12  ;;  %v445_v25 = vpop.f32.mrb[1].mxu1 }
  0xe8   : > { %v425_v18 = vadd.f32 %v971_v17, %v895_v12  ;;  %v416_v19 = vpop.f32.mrb[3].mxu0  ;;  %v478_v22 = vmax.f32 %v422_v14, 0.0  ;;  %v446_v28 = vadd.f32 %v895_v12, %v445_v25  ;;  %v979_v29 = vpop.f32.mrb[2].mxu1 }
  0xe9   : > { %v417_v20 = vadd.f32 %v895_v12, %v416_v19  ;;  %v476_v26 = vmax.f32 %v414_v16, 0.0  ;;  %v486_v31 = vmax.f32 %v454_v24, 0.0  ;;  %v457_v32 = vadd.f32 %v979_v29, %v895_v12  ;;  %v448_v33 = vpop.f32.mrb[3].mxu1 }
  0xea   : > { %v479_v23 = vmax.f32 %v425_v18, 0.0  ;;  %v484_v36 = vmax.f32 %v446_v28, 0.0  ;;  %v449_v37 = vadd.f32 %v895_v12, %v448_v33 }
  0xeb   : > { %v477_v27 = vmax.f32 %v417_v20, 0.0  ;;  %v487_v40 = vmax.f32 %v457_v32, 0.0 }
  0xec   : > { %v493_v30 = vpack.c.bf16 %v479_v23, %v478_v22  ;;  %v485_v43 = vmax.f32 %v449_v37, 0.0 }
  0xed   : > { %v492_v34 = vpack.c.bf16 %v477_v27, %v476_v26  ;;  %v974_v35 = vpop.f32.mrb[4].mxu0  ;;  %v497_v46 = vpack.c.bf16 %v487_v40, %v486_v31 }
  0xee   : > { %v438_v38 = vadd.f32 %v974_v35, %v895_v12  ;;  %v429_v39 = vpop.f32.mrb[5].mxu0  ;;  %v496_v48 = vpack.c.bf16 %v485_v43, %v484_v36  ;;  %v982_v49 = vpop.f32.mrb[4].mxu1 }
  0xef   : > { %v430_v41 = vadd.f32 %v895_v12, %v429_v39  ;;  %v975_v42 = vpop.f32.mrb[6].mxu0  ;;  %988 = vmatprep.mubr.msk.bf16.mxu1 %vm523_vm1, %v492_v34  ;;  %v470_v52 = vadd.f32 %v982_v49, %v895_v12  ;;  %v461_v53 = vpop.f32.mrb[5].mxu1 }
  0xf0   : > { %v441_v44 = vadd.f32 %v975_v42, %v895_v12  ;;  %v432_v45 = vpop.f32.mrb[7].mxu0  ;;  %989 = vmatmul.mubr.msk.bf16.vlgmr.msra.gmra.mrb[8].mxu1 %vm523_vm1, %v493_v30  ;;  %v482_v50 = vmax.f32 %v438_v38, 0.0  ;;  %v462_v56 = vadd.f32 %v895_v12, %v461_v53  ;;  %v983_v57 = vpop.f32.mrb[6].mxu1 }
  0xf1   : > { %v433_v47 = vadd.f32 %v895_v12, %v432_v45  ;;  %v480_v54 = vmax.f32 %v430_v41, 0.0  ;;  %v490_v59 = vmax.f32 %v470_v52, 0.0  ;;  %v473_v60 = vadd.f32 %v983_v57, %v895_v12  ;;  %v464_v61 = vpop.f32.mrb[7].mxu1 }
  0xf2   : > { %v483_v51 = vmax.f32 %v441_v44, 0.0  ;;  %v488_v63 = vmax.f32 %v462_v56, 0.0  ;;  %v465_v0 = vadd.f32 %v895_v12, %v464_v61 }
  0xf3   : > { %v481_v55 = vmax.f32 %v433_v47, 0.0  ;;  %v491_v1 = vmax.f32 %v473_v60, 0.0 }
  0xf4   : > { %v495_v58 = vpack.c.bf16 %v483_v51, %v482_v50  ;;  %v489_v2 = vmax.f32 %v465_v0, 0.0 }
  0xf5   : > { %v494_v62 = vpack.c.bf16 %v481_v55, %v480_v54  ;;  %v499_v3 = vpack.c.bf16 %v491_v1, %v490_v59 }
  0xf6   : > { %v498_v4 = vpack.c.bf16 %v489_v2, %v488_v63  ;;  %v924_v63 = vld [vmem:[%s1204_s6] ss:$0 sm:$0xff] }
  0xf7   : > { %992 = vmatprep.mubr.msk.bf16.mxu1 %vm523_vm1, %v494_v62 }
  0xf8   : > { %993 = vmatmul.mubr.msk.bf16.gmra.mrb[12].mxu1 %vm523_vm1, %v495_v58 }
  0xf9   : > { %996 = vmatprep.mubr.msk.bf16.mxu1 %vm523_vm1, %v496_v48 }
 0x100   : > { %997 = vmatmul.mubr.msk.bf16.gmra.mrb[16].mxu1 %vm523_vm1, %v497_v46 }
 0x101   : > { %1000 = vmatprep.mubr.msk.bf16.mxu1 %vm523_vm1, %v498_v4 }
 0x108   : > { %1001 = vmatmul.mubr.msk.bf16.gmra.mrb[20].mxu1 %vm523_vm1, %v499_v3 }
 0x1c3   : > { %v990_v7 = vpop.f32.mrb[8].mxu1 }
 0x1c4   : > { %v591_v8 = vadd.f32 %v990_v7, %v913_v6  ;;  %v582_v9 = vpop.f32.mrb[9].mxu1 }
 0x1c5   : > { %v583_v10 = vadd.f32 %v913_v6, %v582_v9  ;;  %v991_v11 = vpop.f32.mrb[10].mxu1 }
 0x1c6   : > { %v594_v12 = vadd.f32 %v991_v11, %v913_v6  ;;  %v585_v13 = vpop.f32.mrb[11].mxu1  ;;  %v647_v15 = vmax.f32 %v591_v8, 0.0 }
 0x1c7   : > { %v586_v14 = vadd.f32 %v913_v6, %v585_v13  ;;  %v645_v17 = vmax.f32 %v583_v10, 0.0 }
 0x1c8   : > { %v648_v16 = vmax.f32 %v594_v12, 0.0 }
 0x1c9   : > { %v646_v18 = vmax.f32 %v586_v14, 0.0 }
 0x1ca   : > { %v662_v19 = vpack.c.bf16 %v648_v16, %v647_v15 }
 0x1cb   : > { %v661_v20 = vpack.c.bf16 %v646_v18, %v645_v17  ;;  %v994_v21 = vpop.f32.mrb[12].mxu1 }
 0x1cc   : > { %v607_v22 = vadd.f32 %v994_v21, %v913_v6  ;;  %v598_v23 = vpop.f32.mrb[13].mxu1 }
 0x1cd   : > { %v599_v24 = vadd.f32 %v913_v6, %v598_v23  ;;  %v995_v25 = vpop.f32.mrb[14].mxu1  ;;  %1008 = vmatprep.mubr.msk.bf16.mxu0 %vm523_vm1, %v661_v20 }
 0x1ce   : > { %v610_v26 = vadd.f32 %v995_v25, %v913_v6  ;;  %v601_v27 = vpop.f32.mrb[15].mxu1  ;;  %1009 = vmatmul.mubr.msk.bf16.vlgmr.msra.gmra.mrb[8].mxu0 %vm523_vm1, %v662_v19  ;;  %v651_v29 = vmax.f32 %v607_v22, 0.0 }
 0x1cf   : > { %v602_v28 = vadd.f32 %v913_v6, %v601_v27  ;;  %v649_v31 = vmax.f32 %v599_v24, 0.0 }
 0x1d0   : > { %v652_v30 = vmax.f32 %v610_v26, 0.0 }
 0x1d1   : > { %v650_v32 = vmax.f32 %v602_v28, 0.0 }
 0x1d2   : > { %v664_v33 = vpack.c.bf16 %v652_v30, %v651_v29 }
 0x1d3   : > { %v663_v34 = vpack.c.bf16 %v650_v32, %v649_v31  ;;  %v998_v35 = vpop.f32.mrb[16].mxu1 }
 0x1d4   : > { %v623_v36 = vadd.f32 %v998_v35, %v913_v6  ;;  %v614_v37 = vpop.f32.mrb[17].mxu1 }
 0x1d5   : > { %v615_v38 = vadd.f32 %v913_v6, %v614_v37  ;;  %v999_v39 = vpop.f32.mrb[18].mxu1  ;;  %1012 = vmatprep.mubr.msk.bf16.mxu0 %vm523_vm1, %v663_v34 }
 0x1d6   : > { %v626_v40 = vadd.f32 %v999_v39, %v913_v6  ;;  %v617_v41 = vpop.f32.mrb[19].mxu1  ;;  %1013 = vmatmul.mubr.msk.bf16.gmra.mrb[12].mxu0 %vm523_vm1, %v664_v33  ;;  %v655_v43 = vmax.f32 %v623_v36, 0.0 }
 0x1d7   : > { %v618_v42 = vadd.f32 %v913_v6, %v617_v41  ;;  %v653_v45 = vmax.f32 %v615_v38, 0.0 }
 0x1d8   : > { %v656_v44 = vmax.f32 %v626_v40, 0.0 }
 0x1d9   : > { %v654_v46 = vmax.f32 %v618_v42, 0.0 }
 0x1da   : > { %v666_v47 = vpack.c.bf16 %v656_v44, %v655_v43 }
 0x1db   : > { %v665_v48 = vpack.c.bf16 %v654_v46, %v653_v45  ;;  %v1002_v49 = vpop.f32.mrb[20].mxu1 }
 0x1dc   : > { %v639_v50 = vadd.f32 %v1002_v49, %v913_v6  ;;  %v630_v51 = vpop.f32.mrb[21].mxu1 }
 0x1dd   : > { %v631_v52 = vadd.f32 %v913_v6, %v630_v51  ;;  %v1003_v53 = vpop.f32.mrb[22].mxu1  ;;  %1016 = vmatprep.mubr.msk.bf16.mxu0 %vm523_vm1, %v665_v48 }
 0x1de   : > { %v642_v54 = vadd.f32 %v1003_v53, %v913_v6  ;;  %v633_v55 = vpop.f32.mrb[23].mxu1  ;;  %1017 = vmatmul.mubr.msk.bf16.gmra.mrb[16].mxu0 %vm523_vm1, %v666_v47  ;;  %v659_v57 = vmax.f32 %v639_v50, 0.0 }
 0x1df   : > { %v634_v56 = vadd.f32 %v913_v6, %v633_v55  ;;  %v657_v59 = vmax.f32 %v631_v52, 0.0 }
 0x1e0   : > { %v660_v58 = vmax.f32 %v642_v54, 0.0 }
 0x1e1   : > { %v658_v60 = vmax.f32 %v634_v56, 0.0 }
 0x1e2   : > { %v668_v61 = vpack.c.bf16 %v660_v58, %v659_v57 }
 0x1e3   : > { %v667_v62 = vpack.c.bf16 %v658_v60, %v657_v59 }
 0x1e5   : > { %1020 = vmatprep.mubr.msk.bf16.mxu0 %vm523_vm1, %v667_v62 }
 0x1e6   : > { %1021 = vmatmul.mubr.msk.bf16.gmra.mrb[20].mxu0 %vm523_vm1, %v668_v61 }
 0x2a1   : > { %v1010_v0 = vpop.f32.mrb[8].mxu0 }
 0x2a2   : > { %v759_v1 = vadd.f32 %v1010_v0, %v924_v63  ;;  %v750_v2 = vpop.f32.mrb[9].mxu0 }
 0x2a3   : > { %v751_v3 = vadd.f32 %v924_v63, %v750_v2  ;;  %v1011_v4 = vpop.f32.mrb[10].mxu0 }
 0x2a4   : > { %816 = vst.msk [vmem:[%s1161_s29 + $0x10] sm:$0xff] %vm813_vm2, %v759_v1  ;;  %v762_v5 = vadd.f32 %v1011_v4, %v924_v63  ;;  %v753_v6 = vpop.f32.mrb[11].mxu0 }
 0x2a5   : > { %814 = vst.msk [vmem:[%s1161_s29] sm:$0xff] %vm813_vm2, %v751_v3  ;;  %v754_v7 = vadd.f32 %v924_v63, %v753_v6 }
 0x2a6   : > { %817 = vst.msk [vmem:[%s1161_s29 + $0x18] sm:$0xff] %vm813_vm2, %v762_v5 }
 0x2a7   : > { %815 = vst.msk [vmem:[%s1161_s29 + $0x8] sm:$0xff] %vm813_vm2, %v754_v7 }
 0x2a9   : > { %v1014_v8 = vpop.f32.mrb[12].mxu0 }
 0x2aa   : > { %v775_v9 = vadd.f32 %v1014_v8, %v924_v63  ;;  %v766_v10 = vpop.f32.mrb[13].mxu0 }
 0x2ab   : > { %v767_v11 = vadd.f32 %v924_v63, %v766_v10  ;;  %v1015_v12 = vpop.f32.mrb[14].mxu0 }
 0x2ac   : > { %820 = vst.msk [vmem:[%s1161_s29 + $0x30] sm:$0xff] %vm813_vm2, %v775_v9  ;;  %v778_v13 = vadd.f32 %v1015_v12, %v924_v63  ;;  %v769_v14 = vpop.f32.mrb[15].mxu0 }
 0x2ad   : > { %818 = vst.msk [vmem:[%s1161_s29 + $0x20] sm:$0xff] %vm813_vm2, %v767_v11  ;;  %v770_v15 = vadd.f32 %v924_v63, %v769_v14 }
 0x2ae   : > { %821 = vst.msk [vmem:[%s1161_s29 + $0x38] sm:$0xff] %vm813_vm2, %v778_v13 }
 0x2af   : > { %819 = vst.msk [vmem:[%s1161_s29 + $0x28] sm:$0xff] %vm813_vm2, %v770_v15 }
 0x2b1   : > { %v1018_v16 = vpop.f32.mrb[16].mxu0 }
 0x2b2   : > { %v791_v17 = vadd.f32 %v1018_v16, %v924_v63  ;;  %v782_v18 = vpop.f32.mrb[17].mxu0 }
 0x2b3   : > { %v783_v19 = vadd.f32 %v924_v63, %v782_v18  ;;  %v1019_v20 = vpop.f32.mrb[18].mxu0 }
 0x2b4   : > { %824 = vst.msk [vmem:[%s1161_s29 + $0x50] sm:$0xff] %vm813_vm2, %v791_v17  ;;  %v794_v21 = vadd.f32 %v1019_v20, %v924_v63  ;;  %v785_v22 = vpop.f32.mrb[19].mxu0 }
 0x2b5   : > { %822 = vst.msk [vmem:[%s1161_s29 + $0x40] sm:$0xff] %vm813_vm2, %v783_v19  ;;  %v786_v23 = vadd.f32 %v924_v63, %v785_v22 }
 0x2b6   : > { %825 = vst.msk [vmem:[%s1161_s29 + $0x58] sm:$0xff] %vm813_vm2, %v794_v21 }
 0x2b7   : > { %823 = vst.msk [vmem:[%s1161_s29 + $0x48] sm:$0xff] %vm813_vm2, %v786_v23 }
 0x2b9   : > { %v1022_v24 = vpop.f32.mrb[20].mxu0 }
 0x2ba   : > { %v807_v25 = vadd.f32 %v1022_v24, %v924_v63  ;;  %v798_v26 = vpop.f32.mrb[21].mxu0 }
 0x2bb   : > { %v799_v27 = vadd.f32 %v924_v63, %v798_v26  ;;  %v1023_v28 = vpop.f32.mrb[22].mxu0 }
 0x2bc   : > { %828 = vst.msk [vmem:[%s1161_s29 + $0x70] sm:$0xff] %vm813_vm2, %v807_v25  ;;  %v810_v29 = vadd.f32 %v1023_v28, %v924_v63  ;;  %v801_v30 = vpop.f32.mrb[23].mxu0 }
 0x2bd   : > { %826 = vst.msk [vmem:[%s1161_s29 + $0x60] sm:$0xff] %vm813_vm2, %v799_v27  ;;  %v802_v31 = vadd.f32 %v924_v63, %v801_v30 }
 0x2be   : > { %829 = vst.msk [vmem:[%s1161_s29 + $0x78] sm:$0xff] %vm813_vm2, %v810_v29 }
 0x2bf   : > { %827 = vst.msk [vmem:[%s1161_s29 + $0x68] sm:$0xff] %vm813_vm2, %v802_v31 }
 0x2c0 PF: > { %s17_s24 = sadd.s32 1, %s1053_s24  }
 0x2c1   : > { %p14_p4 = scmp.ge.s32.totalorder %s17_s24, 4  }
 0x2c3   :  { %16 = sbr.rel (!%p14_p4) target bundleno = 1 (0x1), region = 78 }

</bundles_post_ra>
